<compile_context>
chip_gen: v6e
topology: v6e:2x2x1
jax: 0.10.0
libtpu: 0.0.40
codegen_flags: <defaults>
</compile_context>

<pallas_src>
import jax
import jax.numpy as jnp
from jax.experimental import pallas as pl
from jax.experimental.pallas import tpu as pltpu

_LANES = 128


def _copy_kernel(x_ref, o_ref):
    # Identity copy of the current tile (the only "compute" of an unsqueeze).
    o_ref[...] = x_ref[...]


def _row_tile(rows: int) -> int:
    """Pick a sublane-aligned row tile: full array if small, else ≤512 rows."""
    if rows <= 8:
        return rows                      # equals full dim -> always legal
    t = min(512, rows)
    return max(8, (t // 8) * 8)          # multiple of 8


def _identity_copy_2d(x2d: jax.Array) -> jax.Array:
    rows, cols = x2d.shape
    tile_r = _row_tile(rows)
    grid = (pl.cdiv(rows, tile_r),)

    return pl.pallas_call(
        _copy_kernel,
        out_shape=jax.ShapeDtypeStruct((rows, cols), x2d.dtype),
        grid=grid,
        in_specs=[pl.BlockSpec((tile_r, cols), lambda i: (i, 0))],
        out_specs=pl.BlockSpec((tile_r, cols), lambda i: (i, 0)),
        compiler_params=pltpu.CompilerParams(
            # Independent tiles -> allow megacore sharding on v7x.
            dimension_semantics=("parallel",),
            # Tiles are small (<=512*cols*4B doubled-buffered); this just gives
            # headroom on v5e's small scoped-VMEM default.
            vmem_limit_bytes=64 * 1024 * 1024,
        ),
    )(x2d)


def unsqueeze_last(x: jax.Array) -> jax.Array:
    """Equivalent of torch.unsqueeze(x, -1) for a rank-3 input."""
    assert x.ndim == 3, "net_Unsqueeze (R3 variant) expects a rank-3 input"
    d0, d1, d2 = x.shape
    total = d0 * d1 * d2

    # Lane-dense view when possible: every vreg fully used, unmasked stores.
    if total % _LANES == 0:
        x2d = x.reshape(total // _LANES, _LANES)
    else:
        # Fallback: keep the innermost dim as-is (full-extent last block dim).
        x2d = x.reshape(d0 * d1, d2)

    out2d = _identity_copy_2d(x2d)

    # The unsqueeze itself: add the trailing size-1 axis (metadata only).
    return out2d.reshape(d0, d1, d2, 1)


def _check(x: jax.Array) -> None:
    y = unsqueeze_last(x)
    jax.block_until_ready(y)
    y_ref = jnp.expand_dims(x, -1)
    assert y.shape == x.shape + (1,), (y.shape, x.shape)
    assert y.dtype == x.dtype
    assert jnp.array_equal(y, y_ref)


if __name__ == "__main__":
    key = jax.random.PRNGKey(0)

    # Primary shape consistent with the R3 module: (2, 4, 16).
    k0, k1, k2 = jax.random.split(key, 3)
    _check(jax.random.normal(k0, (2, 4, 16), dtype=jnp.float32))

    # Extra coverage: non-128-divisible fallback path and a multi-tile grid.
    _check(jax.random.normal(k1, (3, 5, 7), dtype=jnp.float32))
    _check(jax.random.normal(k2, (16, 64, 128), dtype=jnp.float32))

    print("KERNEL_OK")
</pallas_src>

<mosaic_0001>
module attributes {stable_mosaic.version = 11 : i64} {
  func.func @_copy_kernel(%arg0: i32, %arg1: memref<1x128xf32, #tpu.memory_space<vmem>>, %arg2: memref<1x128xf32, #tpu.memory_space<vmem>>) attributes {dimension_semantics = [#tpu.dimension_semantics<parallel>], iteration_bounds = array<i64: 1>, scalar_prefetch = 0 : i64, scratch_operands = 0 : i64, tpu.core_type = #tpu.core_type<tc>, window_params = [{transform_indices = @transform_0, window_bounds = array<i64: 1, 128>}, {transform_indices = @transform_1, window_bounds = array<i64: 1, 128>}]} {
    %c0 = arith.constant 0 : index
    %c0_0 = arith.constant 0 : index
    %0 = vector.load %arg1[%c0, %c0_0] : memref<1x128xf32, #tpu.memory_space<vmem>>, vector<1x128xf32>
    %c0_1 = arith.constant 0 : index
    %c0_2 = arith.constant 0 : index
    %1 = vector.load %arg2[%c0_1, %c0_2] : memref<1x128xf32, #tpu.memory_space<vmem>>, vector<1x128xf32>
    tpu.vector_store %arg2[%c0_1, %c0_2], %0 {strides = array<i32>} : memref<1x128xf32, #tpu.memory_space<vmem>>, vector<1x128xf32>,
    return
  }
  func.func @transform_0(%arg0: i32) -> (i32, i32) {
    %c0_i32 = arith.constant 0 : i32
    %c0_i32_0 = arith.constant 0 : i32
    return %arg0, %c0_i32 : i32, i32
  }
  func.func @transform_1(%arg0: i32) -> (i32, i32) {
    %c0_i32 = arith.constant 0 : i32
    %c0_i32_0 = arith.constant 0 : i32
    return %arg0, %c0_i32 : i32, i32
  }
}

</mosaic_0001>

<bundles_post_ra>
// kernel: tpu_custom_call.1
= control target key start
LH: loop header
LB: loop body
LE: loop exit
PB: predicated region body
PF: predicated region fallthrough
CT: control target
= control target key end

     0   :  { %6 = vsyncpa [#allocation3], 0  ;;  %s102_s0 = inlined_call_operand.hbm [shape: f32[1,128], index: 0, kind: input, shape index: {}]   ;;  %s103_s1 = inlined_call_operand.hbm [shape: f32[1,128], index: 1, kind: output, shape index: {}]  }
   0x1   :  { %7 = vsyncpa [#allocation4], 0  ;;  %s84_s6 = smov [#allocation2]  }
   0x2   :  { %s14_s7 = sshll.u32 %s84_s6, 4  ;;  %s15_s7 = int_to_ptr.vmem [resolvable:$true] %s14_s7 }
   0x3   :  { %s48_s8 = scalar_lea.vmem %s15_s7, 16  ;;  %s52_s9 = scalar_lea.vmem %s15_s7, 32 }
   0x4   :  { %p49_p0 = scmp.ne.s32.totalorder %s15_s7, %s48_s8  ;;  %p53_p1 = scmp.lt.s32.totalorder %s15_s7, %s15_s7 }
   0x5   :  { %p54_p2 = scmp.lt.s32.totalorder %s52_s9, %s48_s8 }
   0x7   :  { %p55_p3 = por %p54_p2, %p53_p1 }
   0x9   :  { %p56_p4 = pnand %p55_p3, %p49_p0 }
   0xb   :  { %59 = shalt.err (!%p56_p4)
}
   0xc   :  { %17 = dma.hbm_to_vmem [thread:$0]  %s102_s0, 16, %s15_s7, [#allocation3]  }
   0xd   :  { %80 = dma.done.wait [#allocation3], 16  }
   0xe   :  { %81 = vsyncadd [#allocation3], 4294967280  ;;  %s85_s12 = smov [#allocation5]   ;;  %v21_v0 = vld [vmem:[#allocation2] sm:$0x1] }
   0xf   :  { %s29_s13 = sshll.u32 %s85_s12, 4  ;;  %22 = vst [vmem:[#allocation5] sm:$0x1] %v21_v0  ;;  %s30_s13 = int_to_ptr.vmem [resolvable:$true] %s29_s13 }
  0x10   :  { %s60_s14 = scalar_lea.vmem %s30_s13, 16  ;;  %s64_s15 = scalar_lea.vmem %s30_s13, 32 }
  0x11   :  { %p61_p5 = scmp.ne.s32.totalorder %s30_s13, %s60_s14  ;;  %p65_p6 = scmp.lt.s32.totalorder %s30_s13, %s30_s13 }
  0x12   :  { %p66_p7 = scmp.lt.s32.totalorder %s64_s15, %s60_s14 }
  0x14   :  { %p67_p8 = por %p66_p7, %p65_p6 }
  0x16   :  { %p68_p9 = pnand %p67_p8, %p61_p5 }
  0x18   :  { %71 = shalt.err (!%p68_p9)
}
  0x19   :  { %32 = dma.vmem_to_hbm [thread:$0]  %s30_s13, 16, %s103_s1, [#allocation4]  }
  0x1a   :  { %82 = dma.done.wait [#allocation4], 16  }
  0x1b   :  { %83 = vsyncadd [#allocation4], 4294967280 }
  0x1c   :  { %36 = vsyncpa [#allocation3], 1 }
  0x1d   :  { %37 = vsyncpa [#allocation4], 1 }

</bundles_post_ra>
